<compile_context>
chip_gen: v5e
topology: v5e:2x2
jax: 0.10.0
libtpu: 0.0.40
codegen_flags: <defaults>
</compile_context>

<pallas_src>
import functools

import jax
import jax.numpy as jnp
from jax.experimental import pallas as pl
from jax.experimental.pallas import tpu as pltpu


def _round_up(n, m):
    return ((n + m - 1) // m) * m


# ----------------------------------------------------------------------------
# Kernel
# ----------------------------------------------------------------------------
def _latent_space_kernel(latent_dim,
                         x_ref, w1_ref, b1_ref, wh_ref, bh_ref, eps_ref,
                         wscale_ref, out_ref):
    L = latent_dim

    # Layer 1: Linear(input_dim, 512) + SiLU.  bf16 operands on the MXU
    # (x cast in-kernel), f32 accumulate, f32 epilogue.
    x = x_ref[...].astype(jnp.bfloat16)
    h = jnp.dot(x, w1_ref[...], preferred_element_type=jnp.float32) + b1_ref[...]
    # SiLU = h * sigmoid(h) = h * (0.5*tanh(0.5*h) + 0.5): ONE EUP push/elem.
    h = h * (0.5 * jnp.tanh(0.5 * h) + 0.5)

    # Fused, lane-dense head: (512, Np) matmul where columns are
    # [Wmu | Wlv | zeros]; Np is a multiple of 128.
    heads = jnp.dot(h.astype(jnp.bfloat16), wh_ref[...],
                    preferred_element_type=jnp.float32) + bh_ref[...]
    mu = heads[:, :L]
    logvar = heads[:, L:2 * L]

    # Reparametrization + tanh.  sigma = exp(0.5*logvar) == sqrt(exp(logvar)).
    w = wscale_ref[0]                                  # scalar from SMEM
    z = jnp.tanh(mu + w * jnp.exp(0.5 * logvar) * eps_ref[...])

    # Single packed, lane-dense (TB, Np) output: [mu | logvar | z | 0-pad].
    out_ref[...] = heads
    out_ref[:, 2 * L:3 * L] = z


# ----------------------------------------------------------------------------
# Parameter preparation (done ONCE, not per forward call)
# ----------------------------------------------------------------------------
def prepare_params(params):
    """Fuse fc_mu/fc_logvar into one zero-padded, bf16 head and pre-cast W1."""
    w1, b1, wmu, bmu, wlv, blv = params
    input_dim, hidden = w1.shape
    L = wmu.shape[1]
    Np = _round_up(3 * L, 128)          # packed output lanes: [mu|logvar|z|pad]

    wh = jnp.zeros((hidden, Np), jnp.float32)
    wh = wh.at[:, :L].set(wmu).at[:, L:2 * L].set(wlv)
    bh = jnp.zeros((Np,), jnp.float32)
    bh = bh.at[:L].set(bmu).at[L:2 * L].set(blv)

    return {
        "w1": w1.astype(jnp.bfloat16),                     # (input_dim, hidden)
        "b1": b1.reshape(1, -1).astype(jnp.float32),       # (1, hidden)
        "wh": wh.astype(jnp.bfloat16),                     # (hidden, Np)
        "bh": bh.reshape(1, -1).astype(jnp.float32),       # (1, Np)
        "input_dim": input_dim,
        "hidden": hidden,
        "latent_dim": L,
        "packed_dim": Np,
    }


def _pick_batch_tile(B, input_dim, hidden, Np, L, block_batch):
    """Largest batch tile within a conservative VMEM budget (v5e-safe)."""
    budget = 12 * 1024 * 1024          # below v5e's 16 MiB scoped default
    # double-buffered bf16 weights + f32 biases (grid-invariant, VMEM-resident)
    weights = 2 * (input_dim * hidden * 2 + hidden * Np * 2) + 4 * (hidden + Np)
    # per batch row, double-buffered: x (f32) + packed out (f32) + eps (f32)
    per_row = 2 * (input_dim * 4 + Np * 4 + L * 4)
    tb = min(block_batch, _round_up(B, 8))
    while tb > 8 and weights + tb * per_row > budget:
        tb = _round_up(tb // 2, 8)
    return max(tb, 8)


# ----------------------------------------------------------------------------
# Forward wrapper
# ----------------------------------------------------------------------------
def latent_space_forward(x, prep, eps, *, weight=1.0, block_batch=1024,
                         core_parallel=False):
    """x: [B, input_dim] f32, eps: [B, latent_dim] f32. Returns (mu, logvar, z)."""
    B, input_dim = x.shape
    hidden = prep["hidden"]
    L = prep["latent_dim"]
    Np = prep["packed_dim"]
    assert input_dim == prep["input_dim"]

    TB = _pick_batch_tile(B, input_dim, hidden, Np, L, block_batch)
    grid = (pl.cdiv(B, TB),)           # partial last block; no pad copy of x/eps

    wscale = jnp.full((1,), weight, dtype=jnp.float32)   # runtime scalar, no retrace

    # On v7x, core_parallel=True shards the batch grid axis across both
    # TensorCores; plain "parallel" is the portable default for v5e/v6e.
    dim_sem = (pltpu.CORE_PARALLEL,) if core_parallel else ("parallel",)

    packed = pl.pallas_call(
        functools.partial(_latent_space_kernel, L),
        out_shape=jax.ShapeDtypeStruct((B, Np), jnp.float32),
        grid=grid,
        in_specs=[
            pl.BlockSpec((TB, input_dim), lambda i: (i, 0)),      # x tile (f32)
            pl.BlockSpec((input_dim, hidden), lambda i: (0, 0)),  # W1 bf16 (resident)
            pl.BlockSpec((1, hidden), lambda i: (0, 0)),          # b1 (resident)
            pl.BlockSpec((hidden, Np), lambda i: (0, 0)),         # fused head W (resident)
            pl.BlockSpec((1, Np), lambda i: (0, 0)),              # fused head b (resident)
            pl.BlockSpec((TB, L), lambda i: (i, 0)),              # eps tile
            pl.BlockSpec(memory_space=pltpu.MemorySpace.SMEM),    # weight scalar
        ],
        out_specs=pl.BlockSpec((TB, Np), lambda i: (i, 0)),       # [mu|logvar|z|pad]
        compiler_params=pltpu.CompilerParams(dimension_semantics=dim_sem),
    )(x, prep["w1"], prep["b1"], prep["wh"], prep["bh"], eps, wscale)

    mu = packed[:, :L]
    logvar = packed[:, L:2 * L]
    z = packed[:, 2 * L:3 * L]
    return mu, logvar, z


# ----------------------------------------------------------------------------
# Synthetic parameters + pure-JAX reference
# ----------------------------------------------------------------------------
def init_params(key, input_dim, hidden_dim, latent_dim):
    """Deterministic synthetic parameters (PyTorch Linear shapes, pre-transposed)."""
    ks = jax.random.split(key, 6)
    s1 = 1.0 / jnp.sqrt(input_dim)
    s2 = 1.0 / jnp.sqrt(hidden_dim)
    w1 = jax.random.uniform(ks[0], (input_dim, hidden_dim), jnp.float32, -s1, s1)
    b1 = jax.random.uniform(ks[1], (hidden_dim,), jnp.float32, -s1, s1)
    wmu = jax.random.uniform(ks[2], (hidden_dim, latent_dim), jnp.float32, -s2, s2)
    bmu = jax.random.uniform(ks[3], (latent_dim,), jnp.float32, -s2, s2)
    wlv = jax.random.uniform(ks[4], (hidden_dim, latent_dim), jnp.float32, -s2, s2)
    blv = jax.random.uniform(ks[5], (latent_dim,), jnp.float32, -s2, s2)
    return (w1, b1, wmu, bmu, wlv, blv)


def _reference(x, params, eps, weight=1.0):
    """Pure-JAX reference with the same bf16 matmul operands as the kernel."""
    w1, b1, wmu, bmu, wlv, blv = params
    xb = x.astype(jnp.bfloat16)
    h = jnp.dot(xb, w1.astype(jnp.bfloat16), preferred_element_type=jnp.float32) + b1
    h = h * jax.nn.sigmoid(h)
    hb = h.astype(jnp.bfloat16)
    mu = jnp.dot(hb, wmu.astype(jnp.bfloat16), preferred_element_type=jnp.float32) + bmu
    lv = jnp.dot(hb, wlv.astype(jnp.bfloat16), preferred_element_type=jnp.float32) + blv
    z = jnp.tanh(mu + weight * jnp.exp(0.5 * lv) * eps)
    return mu, lv, z


if __name__ == "__main__":
    # Small shapes consistent with the module (hidden dim fixed at 512 by spec).
    batch, input_dim, hidden_dim, latent_dim = 8, 256, 512, 16

    key = jax.random.PRNGKey(0)
    kx, kp, ke = jax.random.split(key, 3)

    x = jax.random.normal(kx, (batch, input_dim), jnp.float32)
    params = init_params(kp, input_dim, hidden_dim, latent_dim)
    eps = jax.random.normal(ke, (batch, latent_dim), jnp.float32)   # N(0,1) noise

    prep = prepare_params(params)            # fuse + cast weights ONCE
    mu, logvar, z = latent_space_forward(x, prep, eps, weight=1.0)
    jax.block_until_ready((mu, logvar, z))

    # Sanity check against a pure-JAX reference using the same bf16 matmul precision.
    mu_r, lv_r, z_r = _reference(x, params, eps, weight=1.0)
    assert jnp.allclose(mu, mu_r, atol=2e-3, rtol=2e-3)
    assert jnp.allclose(logvar, lv_r, atol=2e-3, rtol=2e-3)
    assert jnp.allclose(z, z_r, atol=2e-3, rtol=2e-3)

    print("KERNEL_OK")
</pallas_src>

<mosaic_0001>
module attributes {stable_mosaic.version = 11 : i64} {
  func.func @_latent_space_kernel(%arg0: i32, %arg1: memref<8x256xf32, #tpu.memory_space<vmem>>, %arg2: memref<256x512xbf16, #tpu.memory_space<vmem>>, %arg3: memref<1x512xf32, #tpu.memory_space<vmem>>, %arg4: memref<512x128xbf16, #tpu.memory_space<vmem>>, %arg5: memref<1x128xf32, #tpu.memory_space<vmem>>, %arg6: memref<8x16xf32, #tpu.memory_space<vmem>>, %arg7: memref<1xf32, #tpu.memory_space<smem>>, %arg8: memref<8x128xf32, #tpu.memory_space<vmem>>) attributes {dimension_semantics = [#tpu.dimension_semantics<parallel>], iteration_bounds = array<i64: 1>, scalar_prefetch = 0 : i64, scratch_operands = 0 : i64, tpu.core_type = #tpu.core_type<tc>, window_params = [{transform_indices = @transform_0, window_bounds = array<i64: 8, 256>}, {pipeline_mode = #tpu.pipeline_mode<synchronous>, transform_indices = @transform_1, window_bounds = array<i64: 256, 512>}, {pipeline_mode = #tpu.pipeline_mode<synchronous>, transform_indices = @transform_2, window_bounds = array<i64: 1, 512>}, {pipeline_mode = #tpu.pipeline_mode<synchronous>, transform_indices = @transform_3, window_bounds = array<i64: 512, 128>}, {pipeline_mode = #tpu.pipeline_mode<synchronous>, transform_indices = @transform_4, window_bounds = array<i64: 1, 128>}, {transform_indices = @transform_5, window_bounds = array<i64: 8, 16>}, {transform_indices = @transform_6, window_bounds = array<i64: 1>}, {transform_indices = @transform_7, window_bounds = array<i64: 8, 128>}]} {
    %c0 = arith.constant 0 : index
    %c0_0 = arith.constant 0 : index
    %0 = vector.load %arg1[%c0, %c0_0] : memref<8x256xf32, #tpu.memory_space<vmem>>, vector<8x256xf32>
    %1 = arith.truncf %0 : vector<8x256xf32> to vector<8x256xbf16>
    %c0_1 = arith.constant 0 : index
    %c0_2 = arith.constant 0 : index
    %2 = vector.load %arg2[%c0_1, %c0_2] : memref<256x512xbf16, #tpu.memory_space<vmem>>, vector<256x512xbf16>
    %cst = arith.constant dense<0.000000e+00> : vector<8x512xf32>
    %3 = tpu.matmul %1, %2, %cst {dimension_numbers = #tpu.dot_dimension_numbers<[1], [0], [0], [1], [0, 0, 1, 1], [], []>} : vector<8x256xbf16>, vector<256x512xbf16>, vector<8x512xf32> -> vector<8x512xf32>
    %c0_3 = arith.constant 0 : index
    %c0_4 = arith.constant 0 : index
    %4 = vector.load %arg3[%c0_3, %c0_4] : memref<1x512xf32, #tpu.memory_space<vmem>>, vector<1x512xf32>
    %5 = vector.broadcast %4 : vector<1x512xf32> to vector<8x512xf32>
    %6 = arith.addf %3, %5 : vector<8x512xf32>
    %cst_5 = arith.constant 5.000000e-01 : f32
    %7 = vector.broadcast %cst_5 : f32 to vector<8x512xf32>
    %8 = arith.mulf %7, %6 : vector<8x512xf32>
    %9 = math.tanh %8 : vector<8x512xf32>
    %cst_6 = arith.constant 5.000000e-01 : f32
    %10 = vector.broadcast %cst_6 : f32 to vector<8x512xf32>
    %11 = arith.mulf %10, %9 : vector<8x512xf32>
    %cst_7 = arith.constant 5.000000e-01 : f32
    %12 = vector.broadcast %cst_7 : f32 to vector<8x512xf32>
    %13 = arith.addf %11, %12 : vector<8x512xf32>
    %14 = arith.mulf %6, %13 : vector<8x512xf32>
    %15 = arith.truncf %14 : vector<8x512xf32> to vector<8x512xbf16>
    %c0_8 = arith.constant 0 : index
    %c0_9 = arith.constant 0 : index
    %16 = vector.load %arg4[%c0_8, %c0_9] : memref<512x128xbf16, #tpu.memory_space<vmem>>, vector<512x128xbf16>
    %cst_10 = arith.constant dense<0.000000e+00> : vector<8x128xf32>
    %17 = tpu.matmul %15, %16, %cst_10 {dimension_numbers = #tpu.dot_dimension_numbers<[1], [0], [0], [1], [0, 0, 1, 1], [], []>} : vector<8x512xbf16>, vector<512x128xbf16>, vector<8x128xf32> -> vector<8x128xf32>
    %c0_11 = arith.constant 0 : index
    %c0_12 = arith.constant 0 : index
    %18 = vector.load %arg5[%c0_11, %c0_12] : memref<1x128xf32, #tpu.memory_space<vmem>>, vector<1x128xf32>
    %19 = vector.broadcast %18 : vector<1x128xf32> to vector<8x128xf32>
    %20 = arith.addf %17, %19 : vector<8x128xf32>
    %21 = vector.extract_strided_slice %20 {offsets = [0, 0], sizes = [8, 16], strides = [1, 1]} : vector<8x128xf32> to vector<8x16xf32>
    %22 = vector.extract_strided_slice %20 {offsets = [0, 16], sizes = [8, 16], strides = [1, 1]} : vector<8x128xf32> to vector<8x16xf32>
    %c0_13 = arith.constant 0 : index
    %23 = memref.load %arg7[%c0_13] : memref<1xf32, #tpu.memory_space<smem>>
    %cst_14 = arith.constant 5.000000e-01 : f32
    %24 = vector.broadcast %cst_14 : f32 to vector<8x16xf32>
    %25 = arith.mulf %24, %22 : vector<8x16xf32>
    %26 = math.exp %25 : vector<8x16xf32>
    %27 = vector.broadcast %23 : f32 to vector<8x16xf32>
    %28 = arith.mulf %27, %26 : vector<8x16xf32>
    %c0_15 = arith.constant 0 : index
    %c0_16 = arith.constant 0 : index
    %29 = vector.load %arg6[%c0_15, %c0_16] : memref<8x16xf32, #tpu.memory_space<vmem>>, vector<8x16xf32>
    %30 = arith.mulf %28, %29 : vector<8x16xf32>
    %31 = arith.addf %21, %30 : vector<8x16xf32>
    %32 = math.tanh %31 : vector<8x16xf32>
    %c0_17 = arith.constant 0 : index
    %c0_18 = arith.constant 0 : index
    %33 = vector.load %arg8[%c0_17, %c0_18] : memref<8x128xf32, #tpu.memory_space<vmem>>, vector<8x128xf32>
    tpu.vector_store %arg8[%c0_17, %c0_18], %20 {strides = array<i32>} : memref<8x128xf32, #tpu.memory_space<vmem>>, vector<8x128xf32>,
    %c0_19 = arith.constant 0 : index
    %c32 = arith.constant 32 : index
    %34 = vector.load %arg8[%c0_19, %c32] : memref<8x128xf32, #tpu.memory_space<vmem>>, vector<8x16xf32>
    tpu.vector_store %arg8[%c0_19, %c32], %32 {strides = array<i32>} : memref<8x128xf32, #tpu.memory_space<vmem>>, vector<8x16xf32>,
    return
  }
  func.func @transform_0(%arg0: i32) -> (i32, i32) {
    %c0_i32 = arith.constant 0 : i32
    %c0_i32_0 = arith.constant 0 : i32
    return %arg0, %c0_i32 : i32, i32
  }
  func.func @transform_1(%arg0: i32) -> (i32, i32) {
    %c0_i32 = arith.constant 0 : i32
    %c0_i32_0 = arith.constant 0 : i32
    %c0_i32_1 = arith.constant 0 : i32
    return %c0_i32, %c0_i32_0 : i32, i32
  }
  func.func @transform_2(%arg0: i32) -> (i32, i32) {
    %c0_i32 = arith.constant 0 : i32
    %c0_i32_0 = arith.constant 0 : i32
    %c0_i32_1 = arith.constant 0 : i32
    return %c0_i32, %c0_i32_0 : i32, i32
  }
  func.func @transform_3(%arg0: i32) -> (i32, i32) {
    %c0_i32 = arith.constant 0 : i32
    %c0_i32_0 = arith.constant 0 : i32
    %c0_i32_1 = arith.constant 0 : i32
    return %c0_i32, %c0_i32_0 : i32, i32
  }
  func.func @transform_4(%arg0: i32) -> (i32, i32) {
    %c0_i32 = arith.constant 0 : i32
    %c0_i32_0 = arith.constant 0 : i32
    %c0_i32_1 = arith.constant 0 : i32
    return %c0_i32, %c0_i32_0 : i32, i32
  }
  func.func @transform_5(%arg0: i32) -> (i32, i32) {
    %c0_i32 = arith.constant 0 : i32
    %c0_i32_0 = arith.constant 0 : i32
    return %arg0, %c0_i32 : i32, i32
  }
  func.func @transform_6(%arg0: i32) -> i32 {
    %c0_i32 = arith.constant 0 : i32
    %c0_i32_0 = arith.constant 0 : i32
    return %c0_i32 : i32
  }
  func.func @transform_7(%arg0: i32) -> (i32, i32) {
    %c0_i32 = arith.constant 0 : i32
    %c0_i32_0 = arith.constant 0 : i32
    return %arg0, %c0_i32 : i32, i32
  }
}

</mosaic_0001>

<bundles_post_ra>
// kernel: tpu_custom_call.1
= control target key start
LH: loop header
LB: loop body
LE: loop exit
PB: predicated region body
PF: predicated region fallthrough
CT: control target
= control target key end

     0   :  { %13 = vsyncpa [#allocation4], 0  ;;  %s1735_s0 = inlined_call_operand.hbm [shape: f32[8,256], index: 0, kind: input, shape index: {}]   ;;  %s1736_s1 = inlined_call_operand.hbm [shape: bf16[256,512], index: 1, kind: input, shape index: {}]   ;;  %s1737_s2 = inlined_call_operand.hbm [shape: f32[1,512], index: 2, kind: input, shape index: {}]   ;;  %s1738_s3 = inlined_call_operand.hbm [shape: bf16[512,128], index: 3, kind: input, shape index: {}]   ;;  %s1739_s4 = inlined_call_operand.vmem [shape: f32[1,128], index: 4, kind: input, shape index: {}]   ;;  %s1740_s5 = inlined_call_operand.hbm [shape: f32[8,16], index: 5, kind: input, shape index: {}]   ;;  %s1741_s6 = inlined_call_operand.<no memory space> [shape: f32[1], index: 6, kind: input, shape index: {}]   ;;  %s1742_s7 = inlined_call_operand.hbm [shape: f32[8,128], index: 7, kind: output, shape index: {}]  }
   0x1   :  { %14 = vsyncpa [#allocation7], 0 }
   0x2   :  { %15 = vsyncpa [#allocation10], 0  ;;  %s32_s26 = sshll.u32 %s1736_s1, 4  ;;  %s33_s26 = int_to_ptr.hbm [resolvable:$true] %s32_s26 }
   0x3   :  { %16 = vsyncpa [#allocation5], 0  ;;  %s1639_s27 = smov [#allocation6]   ;;  %s56_s8 = sshll.u32 %s1738_s3, 4  ;;  %s57_s8 = int_to_ptr.hbm [resolvable:$true] %s56_s8 }
   0x4   :  { %s34_s28 = sshll.u32 %s1639_s27, 4  ;;  %s1640_s9 = smov 256   ;;  %s35_s28 = int_to_ptr.vmem [resolvable:$true] %s34_s28 }
   0x5   :  { %s1641_s10 = smov 16   ;;  %s1642_s11 = smov [#allocation9]  }
   0x6   :  { %40 = dma.hbm_to_vmem [thread:$0]  %s33_s26, 8192, %s35_s28, [#allocation7], %s1640_s9, %s1640_s9, %s1641_s10  }
   0x7   :  { %s58_s12 = sshll.u32 %s1642_s11, 4  ;;  %s1643_s13 = smov 64   ;;  %s59_s12 = int_to_ptr.vmem [resolvable:$true] %s58_s12 }
   0x8   :  { %s1644_s14 = smov 4   ;;  %s22_s16 = sshll.u32 %s1735_s0, 4  ;;  %s23_s16 = int_to_ptr.hbm [resolvable:$true] %s22_s16 }
   0x9   :  { %64 = dma.hbm_to_vmem [thread:$0]  %s57_s8, 4096, %s59_s12, [#allocation10], %s1643_s13, %s1643_s13, %s1644_s14  }
   0xa   :  { %s1645_s17 = smov [#allocation3]   ;;  %s46_s20 = sshll.u32 %s1737_s2, 4  ;;  %s47_s20 = int_to_ptr.hbm [resolvable:$true] %s46_s20 }
   0xb   :  { %s24_s18 = sshll.u32 %s1645_s17, 4  ;;  %s1646_s21 = smov [#allocation8]   ;;  %s25_s18 = int_to_ptr.vmem [resolvable:$true] %s24_s18 }
   0xc   :  { %27 = dma.hbm_to_vmem [thread:$0]  %s23_s16, 256, %s25_s18, [#allocation4]  }
   0xd   :  { %s48_s22 = sshll.u32 %s1646_s21, 4  ;;  %s72_s25 = sshll.u32 %s1740_s5, 4  ;;  %s49_s22 = int_to_ptr.vmem [resolvable:$true] %s48_s22  ;;  %s73_s25 = int_to_ptr.hbm [resolvable:$true] %s72_s25 }
   0xe   :  { %51 = dma.hbm_to_vmem [thread:$0]  %s47_s20, 64, %s49_s22, [#allocation7]  }
   0xf   :  { %s1647_s0 = smov [#allocation11]  }
  0x10   :  { %s74_s26 = sshll.u32 %s1647_s0, 4  ;;  %s75_s26 = int_to_ptr.vmem [resolvable:$true] %s74_s26 }
  0x11   :  { %77 = dma.hbm_to_vmem [thread:$0]  %s73_s25, 128, %s75_s26, [#allocation10]  }
  0x12   :  { %1631 = dma.done.wait [#allocation4], 256  }
  0x13   :  { %1632 = vsyncadd [#allocation4], 4294967040 }
  0x14   :  { %1633 = dma.done.wait [#allocation7], 8256  }
  0x15   :  { %1634 = vsyncadd [#allocation7], 4294959040 }
  0x16   :  { %1635 = dma.done.wait [#allocation10], 4224  }
  0x17   :  { %1636 = vsyncadd [#allocation10], 4294963072  ;;  %v1096_v0 = vld [vmem:[#allocation6 + $0xe0] sm:$0xf]  ;;  %v1396_v1 = vld [vmem:[#allocation6 + $0xec] sm:$0xf0] }
  0x18   :  { %v1224_v2 = vld [vmem:[#allocation6 + $0x1e0] sm:$0xf]  ;;  %v1097_v3 = vor.u32 %v1396_v1, %v1096_v0  ;;  %v1428_v4 = vld [vmem:[#allocation6 + $0x1ec] sm:$0xf0]  ;;  %v1394_v5 = vld [vmem:[#allocation6 + $0xe4] sm:$0xf] }
  0x19   :  { %v1098_v6 = vld [vmem:[#allocation6 + $0xf0] sm:$0xf0]  ;;  %v1225_v7 = vor.u32 %v1428_v4, %v1224_v2  ;;  %v1426_v9 = vld [vmem:[#allocation6 + $0x1e4] sm:$0xf]  ;;  %v1080_v11 = vld [vmem:[#allocation6 + $0xc0] sm:$0xf] }
  0x1a   :  { %v1101_v8 = vor.u32 %v1394_v5, %v1098_v6  ;;  %v1226_v10 = vld [vmem:[#allocation6 + $0x1f0] sm:$0xf0]  ;;  %498 = vmatpush.bf16.msra.mxu0 %v1097_v3  ;;  %v1392_v13 = vld [vmem:[#allocation6 + $0xcc] sm:$0xf0]  ;;  %v1208_v14 = vld [vmem:[#allocation6 + $0x1c0] sm:$0xf] }
  0x1b   :  { %v1229_v12 = vor.u32 %v1426_v9, %v1226_v10  ;;  %v1424_v15 = vld [vmem:[#allocation6 + $0x1cc] sm:$0xf0]  ;;  %511 = vmatpush.bf16.msra.mxu1 %v1225_v7  ;;  %v1081_v16 = vor.u32 %v1392_v13, %v1080_v11  ;;  %v1390_v18 = vld [vmem:[#allocation6 + $0xc4] sm:$0xf]  ;;  %v1082_v19 = vld [vmem:[#allocation6 + $0xd0] sm:$0xf0] }
  0x1c   :  { %524 = vmatpush.bf16.msra.mxu2 %v1101_v8  ;;  %v1209_v17 = vor.u32 %v1424_v15, %v1208_v14  ;;  %v1422_v20 = vld [vmem:[#allocation6 + $0x1c4] sm:$0xf]  ;;  %v1085_v21 = vor.u32 %v1390_v18, %v1082_v19  ;;  %v1210_v22 = vld [vmem:[#allocation6 + $0x1d0] sm:$0xf0]  ;;  %v1064_v23 = vld [vmem:[#allocation6 + $0xa0] sm:$0xf] }
  0x1d   :  { %537 = vmatpush.bf16.msra.mxu3 %v1229_v12  ;;  %v1388_v24 = vld [vmem:[#allocation6 + $0xac] sm:$0xf0]  ;;  %v1213_v25 = vor.u32 %v1422_v20, %v1210_v22  ;;  %v1192_v26 = vld [vmem:[#allocation6 + $0x1a0] sm:$0xf]  ;;  %v1386_v28 = vld [vmem:[#allocation6 + $0xa4] sm:$0xf] }
  0x1e   :  { %v1420_v27 = vld [vmem:[#allocation6 + $0x1ac] sm:$0xf0]  ;;  %499 = vmatpush.bf16.msra.mxu0 %v1081_v16  ;;  %v1065_v29 = vor.u32 %v1388_v24, %v1064_v23  ;;  %v1066_v30 = vld [vmem:[#allocation6 + $0xb0] sm:$0xf0]  ;;  %v1418_v31 = vld [vmem:[#allocation6 + $0x1a4] sm:$0xf] }
  0x1f   :  { %v1194_v32 = vld [vmem:[#allocation6 + $0x1b0] sm:$0xf0]  ;;  %512 = vmatpush.bf16.msra.mxu1 %v1209_v17  ;;  %v1193_v33 = vor.u32 %v1420_v27, %v1192_v26  ;;  %v1069_v34 = vor.u32 %v1386_v28, %v1066_v30  ;;  %v1048_v35 = vld [vmem:[#allocation6 + $0x80] sm:$0xf]  ;;  %v1384_v36 = vld [vmem:[#allocation6 + $0x8c] sm:$0xf0] }
  0x20   :  { %525 = vmatpush.bf16.msra.mxu2 %v1085_v21  ;;  %v1176_v37 = vld [vmem:[#allocation6 + $0x180] sm:$0xf]  ;;  %v1197_v38 = vor.u32 %v1418_v31, %v1194_v32  ;;  %v1416_v39 = vld [vmem:[#allocation6 + $0x18c] sm:$0xf0]  ;;  %v1382_v40 = vld [vmem:[#allocation6 + $0x84] sm:$0xf]  ;;  %v1049_v44 = vor.u32 %v1384_v36, %v1048_v35 }
  0x21   :  { %538 = vmatpush.bf16.msra.mxu3 %v1213_v25  ;;  %v1050_v41 = vld [vmem:[#allocation6 + $0x90] sm:$0xf0]  ;;  %v1414_v42 = vld [vmem:[#allocation6 + $0x184] sm:$0xf]  ;;  %v1177_v45 = vor.u32 %v1416_v39, %v1176_v37  ;;  %v1032_v47 = vld [vmem:[#allocation6 + $0x60] sm:$0xf] }
  0x22   :  { %v1178_v43 = vld [vmem:[#allocation6 + $0x190] sm:$0xf0]  ;;  %500 = vmatpush.bf16.msra.mxu0 %v1065_v29  ;;  %v1053_v46 = vor.u32 %v1382_v40, %v1050_v41  ;;  %v1380_v48 = vld [vmem:[#allocation6 + $0x6c] sm:$0xf0]  ;;  %v1160_v49 = vld [vmem:[#allocation6 + $0x160] sm:$0xf] }
  0x23   :  { %513 = vmatpush.bf16.msra.mxu1 %v1193_v33  ;;  %v1181_v50 = vor.u32 %v1414_v42, %v1178_v43  ;;  %v1412_v51 = vld [vmem:[#allocation6 + $0x16c] sm:$0xf0]  ;;  %v1378_v52 = vld [vmem:[#allocation6 + $0x64] sm:$0xf]  ;;  %v1034_v53 = vld [vmem:[#allocation6 + $0x70] sm:$0xf0]  ;;  %v1033_v56 = vor.u32 %v1380_v48, %v1032_v47 }
  0x24   :  { %526 = vmatpush.bf16.msra.mxu2 %v1069_v34  ;;  %v1410_v54 = vld [vmem:[#allocation6 + $0x164] sm:$0xf]  ;;  %v1162_v55 = vld [vmem:[#allocation6 + $0x170] sm:$0xf0]  ;;  %v1161_v57 = vor.u32 %v1412_v51, %v1160_v49  ;;  %v1037_v58 = vor.u32 %v1378_v52, %v1034_v53  ;;  %v1016_v59 = vld [vmem:[#allocation6 + $0x40] sm:$0xf] }
  0x25   :  { %539 = vmatpush.bf16.msra.mxu3 %v1197_v38  ;;  %v1376_v60 = vld [vmem:[#allocation6 + $0x4c] sm:$0xf0]  ;;  %v1144_v61 = vld [vmem:[#allocation6 + $0x140] sm:$0xf]  ;;  %v1165_v62 = vor.u32 %v1410_v54, %v1162_v55  ;;  %v1374_v0 = vld [vmem:[#allocation6 + $0x44] sm:$0xf] }
  0x26   :  { %501 = vmatpush.bf16.msra.mxu0 %v1049_v44  ;;  %v1408_v63 = vld [vmem:[#allocation6 + $0x14c] sm:$0xf0]  ;;  %v1018_v1 = vld [vmem:[#allocation6 + $0x50] sm:$0xf0]  ;;  %v1406_v2 = vld [vmem:[#allocation6 + $0x144] sm:$0xf]  ;;  %v1017_v4 = vor.u32 %v1376_v60, %v1016_v59 }
  0x27   :  { %514 = vmatpush.bf16.msra.mxu1 %v1177_v45  ;;  %v1146_v3 = vld [vmem:[#allocation6 + $0x150] sm:$0xf0]  ;;  %v1145_v5 = vor.u32 %v1408_v63, %v1144_v61  ;;  %v1021_v6 = vor.u32 %v1374_v0, %v1018_v1  ;;  %v1000_v7 = vld [vmem:[#allocation6 + $0x20] sm:$0xf]  ;;  %v1372_v8 = vld [vmem:[#allocation6 + $0x2c] sm:$0xf0] }
  0x28   :  { %527 = vmatpush.bf16.msra.mxu2 %v1053_v46  ;;  %v1128_v9 = vld [vmem:[#allocation6 + $0x120] sm:$0xf]  ;;  %v1149_v10 = vor.u32 %v1406_v2, %v1146_v3  ;;  %v1404_v11 = vld [vmem:[#allocation6 + $0x12c] sm:$0xf0]  ;;  %v1370_v12 = vld [vmem:[#allocation6 + $0x24] sm:$0xf]  ;;  %v1001_v16 = vor.u32 %v1372_v8, %v1000_v7 }
  0x29   :  { %540 = vmatpush.bf16.msra.mxu3 %v1181_v50  ;;  %v1002_v13 = vld [vmem:[#allocation6 + $0x30] sm:$0xf0]  ;;  %v1402_v14 = vld [vmem:[#allocation6 + $0x124] sm:$0xf]  ;;  %v984_v17 = vld [vmem:[#allocation6] sm:$0xf]  ;;  %v1129_v19 = vor.u32 %v1404_v11, %v1128_v9 }
  0x2a   :  { %502 = vmatpush.bf16.msra.mxu0 %v1033_v56  ;;  %v1130_v15 = vld [vmem:[#allocation6 + $0x130] sm:$0xf0]  ;;  %v1368_v18 = vld [vmem:[#allocation6 + $0xc] sm:$0xf0]  ;;  %v1005_v20 = vor.u32 %v1370_v12, %v1002_v13  ;;  %v1112_v21 = vld [vmem:[#allocation6 + $0x100] sm:$0xf] }
  0x2b   :  { %515 = vmatpush.bf16.msra.mxu1 %v1161_v57  ;;  %v1400_v22 = vld [vmem:[#allocation6 + $0x10c] sm:$0xf0]  ;;  %v1366_v23 = vld [vmem:[#allocation6 + $0x4] sm:$0xf]  ;;  %v1133_v24 = vor.u32 %v1402_v14, %v1130_v15  ;;  %v986_v25 = vld [vmem:[#allocation6 + $0x10] sm:$0xf0]  ;;  %v985_v31 = vor.u32 %v1368_v18, %v984_v17 }
  0x2c   :  { %528 = vmatpush.bf16.msra.mxu2 %v1037_v58  ;;  %v1398_v26 = vld [vmem:[#allocation6 + $0x104] sm:$0xf]  ;;  %v1114_v27 = vld [vmem:[#allocation6 + $0x110] sm:$0xf0]  ;;  %v1104_v28 = vld [vmem:[#allocation6 + $0xe8] sm:$0xf]  ;;  %v1113_v35 = vor.u32 %v1400_v22, %v1112_v21  ;;  %v989_v36 = vor.u32 %v1366_v23, %v986_v25 }
  0x2d   :  { %541 = vmatpush.bf16.msra.mxu3 %v1165_v62  ;;  %v1397_v29 = vld [vmem:[#allocation6 + $0xf4] sm:$0xf0]  ;;  %v1232_v30 = vld [vmem:[#allocation6 + $0x1e8] sm:$0xf]  ;;  %v1395_v33 = vld [vmem:[#allocation6 + $0xec] sm:$0xf]  ;;  %v1117_v40 = vor.u32 %v1398_v26, %v1114_v27 }
  0x2e   :  { %503 = vmatpush.bf16.msra.mxu0 %v1017_v4  ;;  %v1429_v32 = vld [vmem:[#allocation6 + $0x1f4] sm:$0xf0]  ;;  %v1106_v34 = vld [vmem:[#allocation6 + $0xf8] sm:$0xf0]  ;;  %v1427_v37 = vld [vmem:[#allocation6 + $0x1ec] sm:$0xf]  ;;  %v1105_v41 = vor.u32 %v1397_v29, %v1104_v28 }
  0x2f   :  { %516 = vmatpush.bf16.msra.mxu1 %v1145_v5  ;;  %v1234_v38 = vld [vmem:[#allocation6 + $0x1f8] sm:$0xf0]  ;;  %v100_v39 = vld [vmem:[#allocation3] sm:$0xff]  ;;  %v1233_v43 = vor.u32 %v1429_v32, %v1232_v30  ;;  %v1109_v44 = vor.u32 %v1395_v33, %v1106_v34  ;;  %v1088_v45 = vld [vmem:[#allocation6 + $0xc8] sm:$0xf]  ;;  %s1649_s29 = smov 32  }
  0x30   :  { %529 = vmatpush.bf16.msra.mxu2 %v1021_v6  ;;  %v101_v42 = vld [vmem:[#allocation3 + $0x8] sm:$0xff]  ;;  %v1216_v47 = vld [vmem:[#allocation6 + $0x1c8] sm:$0xf]  ;;  %v1237_v48 = vor.u32 %v1427_v37, %v1234_v38  ;;  %v1707_v49 = vpack.c.bf16 %v100_v39, %v100_v39  ;;  %v1391_v51 = vld [vmem:[#allocation6 + $0xcc] sm:$0xf]  ;;  %s1650_s30 = smov [#allocation12]  }
  0x31   :  { %542 = vmatpush.bf16.msra.mxu3 %v1149_v10  ;;  %v1393_v46 = vld [vmem:[#allocation6 + $0xd4] sm:$0xf0]  ;;  %v1090_v52 = vld [vmem:[#allocation6 + $0xd8] sm:$0xf0]  ;;  %v1709_v53 = vpack.c.bf16 %v101_v42, %v101_v42  ;;  %v1423_v54 = vld [vmem:[#allocation6 + $0x1cc] sm:$0xf] }
  0x32   :  { %504 = vmatpush.bf16.msra.mxu0 %v1001_v16  ;;  %v1425_v50 = vld [vmem:[#allocation6 + $0x1d4] sm:$0xf0]  ;;  %v1218_v55 = vld [vmem:[#allocation6 + $0x1d8] sm:$0xf0]  ;;  %v1089_v56 = vor.u32 %v1393_v46, %v1088_v45  ;;  %v1093_v58 = vor.u32 %v1391_v51, %v1090_v52  ;;  %v1072_v59 = vld [vmem:[#allocation6 + $0xa8] sm:$0xf] }
  0x33   :  { %517 = vmatpush.bf16.msra.mxu1 %v1129_v19  ;;  %v1217_v57 = vor.u32 %v1425_v50, %v1216_v47  ;;  %v1389_v60 = vld [vmem:[#allocation6 + $0xb4] sm:$0xf0]  ;;  %v1200_v61 = vld [vmem:[#allocation6 + $0x1a8] sm:$0xf]  ;;  %v1221_v62 = vor.u32 %v1423_v54, %v1218_v55  ;;  %v1387_v0 = vld [vmem:[#allocation6 + $0xac] sm:$0xf] }
  0x34   :  { %530 = vmatpush.bf16.msra.mxu2 %v1005_v20  ;;  %v1421_v63 = vld [vmem:[#allocation6 + $0x1b4] sm:$0xf0]  ;;  %v1074_v1 = vld [vmem:[#allocation6 + $0xb8] sm:$0xf0]  ;;  %v1419_v2 = vld [vmem:[#allocation6 + $0x1ac] sm:$0xf]  ;;  %v1073_v4 = vor.u32 %v1389_v60, %v1072_v59 }
  0x35   :  { %543 = vmatpush.bf16.msra.mxu3 %v1133_v24  ;;  %v1202_v3 = vld [vmem:[#allocation6 + $0x1b8] sm:$0xf0]  ;;  %v1201_v5 = vor.u32 %v1421_v63, %v1200_v61  ;;  %v1077_v6 = vor.u32 %v1387_v0, %v1074_v1  ;;  %v1056_v7 = vld [vmem:[#allocation6 + $0x88] sm:$0xf]  ;;  %v1385_v8 = vld [vmem:[#allocation6 + $0x94] sm:$0xf0] }
  0x36   :  { %505 = vmatpush.bf16.msra.mxu0 %v985_v31  ;;  %v1184_v9 = vld [vmem:[#allocation6 + $0x188] sm:$0xf]  ;;  %v1205_v10 = vor.u32 %v1419_v2, %v1202_v3  ;;  %v1417_v11 = vld [vmem:[#allocation6 + $0x194] sm:$0xf0]  ;;  %v1383_v12 = vld [vmem:[#allocation6 + $0x8c] sm:$0xf]  ;;  %v1057_v16 = vor.u32 %v1385_v8, %v1056_v7 }
  0x37   :  { %518 = vmatpush.bf16.msra.mxu1 %v1113_v35  ;;  %v1058_v13 = vld [vmem:[#allocation6 + $0x98] sm:$0xf0]  ;;  %v1415_v14 = vld [vmem:[#allocation6 + $0x18c] sm:$0xf]  ;;  %v1185_v17 = vor.u32 %v1417_v11, %v1184_v9  ;;  %v1040_v19 = vld [vmem:[#allocation6 + $0x68] sm:$0xf] }
  0x38   :  { %531 = vmatpush.bf16.msra.mxu2 %v989_v36  ;;  %v1186_v15 = vld [vmem:[#allocation6 + $0x198] sm:$0xf0]  ;;  %v1061_v18 = vor.u32 %v1383_v12, %v1058_v13  ;;  %v1381_v20 = vld [vmem:[#allocation6 + $0x74] sm:$0xf0]  ;;  %v1168_v21 = vld [vmem:[#allocation6 + $0x168] sm:$0xf] }
  0x39   :  { %544 = vmatpush.bf16.msra.mxu3 %v1117_v40  ;;  %506 = vmatmul.bf16.vlgmr.msra.gmra.mxu0 %v1707_v49  ;;  %v1189_v22 = vor.u32 %v1415_v14, %v1186_v15  ;;  %v1413_v23 = vld [vmem:[#allocation6 + $0x174] sm:$0xf0]  ;;  %v1379_v24 = vld [vmem:[#allocation6 + $0x6c] sm:$0xf]  ;;  %v1042_v25 = vld [vmem:[#allocation6 + $0x78] sm:$0xf0]  ;;  %v1041_v28 = vor.u32 %v1381_v20, %v1040_v19 }
  0x3a   :  { %550 = vmatpush.bf16.msrb.mxu0 %v1105_v41  ;;  %519 = vmatmul.bf16.vlgmr.msra.gmra.mxu1 %v1709_v53  ;;  %v1411_v26 = vld [vmem:[#allocation6 + $0x16c] sm:$0xf]  ;;  %v1170_v27 = vld [vmem:[#allocation6 + $0x178] sm:$0xf0]  ;;  %v1169_v29 = vor.u32 %v1413_v23, %v1168_v21  ;;  %v1045_v30 = vor.u32 %v1379_v24, %v1042_v25  ;;  %v1024_v31 = vld [vmem:[#allocation6 + $0x48] sm:$0xf] }
  0x3b   :  { %563 = vmatpush.bf16.msrb.mxu1 %v1233_v43  ;;  %532 = vmatmul.bf16.vlgmr.msra.gmra.mxu2 %v1707_v49  ;;  %v1377_v32 = vld [vmem:[#allocation6 + $0x54] sm:$0xf0]  ;;  %v1152_v33 = vld [vmem:[#allocation6 + $0x148] sm:$0xf]  ;;  %v1173_v34 = vor.u32 %v1411_v26, %v1170_v27  ;;  %v1375_v36 = vld [vmem:[#allocation6 + $0x4c] sm:$0xf] }
  0x3c   :  { %576 = vmatpush.bf16.msrb.mxu2 %v1109_v44  ;;  %545 = vmatmul.bf16.vlgmr.msra.gmra.mxu3 %v1709_v53  ;;  %v1409_v35 = vld [vmem:[#allocation6 + $0x154] sm:$0xf0]  ;;  %v1026_v37 = vld [vmem:[#allocation6 + $0x58] sm:$0xf0]  ;;  %v1407_v38 = vld [vmem:[#allocation6 + $0x14c] sm:$0xf]  ;;  %v1025_v40 = vor.u32 %v1377_v32, %v1024_v31 }
  0x3d   :  { %589 = vmatpush.bf16.msrb.mxu3 %v1237_v48  ;;  %v1154_v39 = vld [vmem:[#allocation6 + $0x158] sm:$0xf0]  ;;  %v1153_v41 = vor.u32 %v1409_v35, %v1152_v33  ;;  %v1029_v42 = vor.u32 %v1375_v36, %v1026_v37  ;;  %v1008_v43 = vld [vmem:[#allocation6 + $0x28] sm:$0xf]  ;;  %v1373_v44 = vld [vmem:[#allocation6 + $0x34] sm:$0xf0] }
  0x3e   :  { %551 = vmatpush.bf16.msrb.mxu0 %v1089_v56  ;;  %v1136_v45 = vld [vmem:[#allocation6 + $0x128] sm:$0xf]  ;;  %v1157_v46 = vor.u32 %v1407_v38, %v1154_v39  ;;  %v1405_v47 = vld [vmem:[#allocation6 + $0x134] sm:$0xf0]  ;;  %v1371_v48 = vld [vmem:[#allocation6 + $0x2c] sm:$0xf]  ;;  %v1009_v54 = vor.u32 %v1373_v44, %v1008_v43 }
  0x3f   :  { %564 = vmatpush.bf16.msrb.mxu1 %v1217_v57  ;;  %v1010_v50 = vld [vmem:[#allocation6 + $0x38] sm:$0xf0]  ;;  %v1403_v51 = vld [vmem:[#allocation6 + $0x12c] sm:$0xf]  ;;  %v1137_v55 = vor.u32 %v1405_v47, %v1136_v45  ;;  %v992_v57 = vld [vmem:[#allocation6 + $0x8] sm:$0xf] }
  0x40   :  { %577 = vmatpush.bf16.msrb.mxu2 %v1093_v58  ;;  %v1138_v52 = vld [vmem:[#allocation6 + $0x138] sm:$0xf0]  ;;  %v1013_v56 = vor.u32 %v1371_v48, %v1010_v50  ;;  %v1369_v58 = vld [vmem:[#allocation6 + $0x14] sm:$0xf0]  ;;  %v1120_v59 = vld [vmem:[#allocation6 + $0x108] sm:$0xf] }
  0x41   :  { %590 = vmatpush.bf16.msrb.mxu3 %v1221_v62  ;;  %v1141_v60 = vor.u32 %v1403_v51, %v1138_v52  ;;  %v1401_v61 = vld [vmem:[#allocation6 + $0x114] sm:$0xf0]  ;;  %v1367_v62 = vld [vmem:[#allocation6 + $0xc] sm:$0xf]  ;;  %v994_v63 = vld [vmem:[#allocation6 + $0x18] sm:$0xf0]  ;;  %v993_v2 = vor.u32 %v1369_v58, %v992_v57 }
  0x42   :  { %552 = vmatpush.bf16.msrb.mxu0 %v1073_v4  ;;  %v1399_v0 = vld [vmem:[#allocation6 + $0x10c] sm:$0xf]  ;;  %v1122_v1 = vld [vmem:[#allocation6 + $0x118] sm:$0xf0]  ;;  %v1121_v3 = vor.u32 %v1401_v61, %v1120_v59  ;;  %v997_v4 = vor.u32 %v1367_v62, %v994_v63  ;;  %v1436_v8 = vld [vmem:[#allocation9 + $0x30] sm:$0xff]  ;;  %s968_s8 = sshll.u32 %s1650_s30, 4  ;;  %s969_s8 = int_to_ptr.vmem [resolvable:$true] %s968_s8 }
  0x43   :  { %565 = vmatpush.bf16.msrb.mxu1 %v1201_v5  ;;  %v1125_v5 = vor.u32 %v1399_v0, %v1122_v1  ;;  %v1445_v7 = vld [vmem:[#allocation9 + $0x78] sm:$0xff]  ;;  %v1435_v9 = vld [vmem:[#allocation9 + $0x28] sm:$0xff]  ;;  %v1434_v11 = vld [vmem:[#allocation9 + $0x20] sm:$0xff]  ;;  %s970_s11 = sshll.u32 %s1742_s7, 4  ;;  %vm961_vm0 = vcmask 392448   ;;  %s971_s11 = int_to_ptr.hbm [resolvable:$true] %s970_s11 }
  0x44   :  { %578 = vmatpush.bf16.msrb.mxu2 %v1077_v6  ;;  %v1437_v6 = vld [vmem:[#allocation9 + $0x38] sm:$0xff]  ;;  %v1443_v12 = vld [vmem:[#allocation9 + $0x68] sm:$0xff]  ;;  %v1442_v14 = vld [vmem:[#allocation9 + $0x60] sm:$0xff] }
  0x45   :  { %591 = vmatpush.bf16.msrb.mxu3 %v1205_v10  ;;  %v1444_v10 = vld [vmem:[#allocation9 + $0x70] sm:$0xff]  ;;  %v1433_v13 = vld [vmem:[#allocation9 + $0x18] sm:$0xff]  ;;  %v1439_v19 = vld [vmem:[#allocation9 + $0x48] sm:$0xff] }
  0x46   :  { %553 = vmatpush.bf16.msrb.mxu0 %v1057_v16  ;;  %v1432_v15 = vld [vmem:[#allocation9 + $0x10] sm:$0xff]  ;;  %v1441_v16 = vld [vmem:[#allocation9 + $0x58] sm:$0xff]  ;;  %v1438_v21 = vld [vmem:[#allocation9 + $0x40] sm:$0xff] }
  0x47   :  { %566 = vmatpush.bf16.msrb.mxu1 %v1185_v17  ;;  %v1430_v17 = vld [vmem:[#allocation9] sm:$0xff]  ;;  %v1452_v20 = vld [vmem:[#allocation9 + $0xb0] sm:$0xff]  ;;  %v1461_v23 = vld [vmem:[#allocation9 + $0xf8] sm:$0xff] }
  0x48   :  { %579 = vmatpush.bf16.msrb.mxu2 %v1061_v18  ;;  %v1453_v18 = vld [vmem:[#allocation9 + $0xb8] sm:$0xff]  ;;  %v1451_v24 = vld [vmem:[#allocation9 + $0xa8] sm:$0xff]  ;;  %v1460_v26 = vld [vmem:[#allocation9 + $0xf0] sm:$0xff] }
  0x49   :  { %592 = vmatpush.bf16.msrb.mxu3 %v1189_v22  ;;  %v1719_v22 = vld [vmem:[#allocation8] sm:$0xf]  ;;  %v1459_v31 = vld [vmem:[#allocation9 + $0xe8] sm:$0xff]  ;;  %v1458_v36 = vld [vmem:[#allocation9 + $0xe0] sm:$0xff] }
  0x4a   :  { %554 = vmatpush.bf16.msrb.mxu0 %v1041_v28  ;;  %v170_v25 = vperm.slane %v1719_v22, 0  ;;  %v1450_v28 = vld [vmem:[#allocation9 + $0xa0] sm:$0xff]  ;;  %v171_v33 = vperm.slane %v1719_v22, 1  ;;  %v1457_v44 = vld [vmem:[#allocation9 + $0xd8] sm:$0xff]  ;;  %v1456_v50 = vld [vmem:[#allocation9 + $0xd0] sm:$0xff]  ;;  %v172_v0 = vperm.slane %v1719_v22, 2 }
  0x4b   :  { %567 = vmatpush.bf16.msrb.mxu1 %v1169_v29  ;;  %v1455_v57 = vld [vmem:[#allocation9 + $0xc8] sm:$0xff]  ;;  %v1454_v61 = vld [vmem:[#allocation9 + $0xc0] sm:$0xff] }
  0x4c   :  { %580 = vmatpush.bf16.msrb.mxu2 %v1045_v30  ;;  %v944_v1 = vld [vmem:[#allocation11] sm:$0xff] }
  0x4d   :  { %593 = vmatpush.bf16.msrb.mxu3 %v1173_v34  ;;  %v1449_v34 = vld [vmem:[#allocation9 + $0x98] sm:$0xff]  ;;  %946 = vrot.lane.b32.xlu0 %v944_v1, %s1641_s10 }
  0x4e   :  { %555 = vmatpush.bf16.msrb.mxu0 %v1025_v40 }
  0x4f   :  { %568 = vmatpush.bf16.msrb.mxu1 %v1153_v41  ;;  %v1448_v41 = vld [vmem:[#allocation9 + $0x90] sm:$0xff] }
  0x50   :  { %581 = vmatpush.bf16.msrb.mxu2 %v1029_v42 }
  0x51   :  { %594 = vmatpush.bf16.msrb.mxu3 %v1157_v46  ;;  %v1447_v46 = vld [vmem:[#allocation9 + $0x88] sm:$0xff] }
  0x52   :  { %556 = vmatpush.bf16.msrb.mxu0 %v1009_v54 }
  0x53   :  { %569 = vmatpush.bf16.msrb.mxu1 %v1137_v55  ;;  %v1446_v55 = vld [vmem:[#allocation9 + $0x80] sm:$0xff] }
  0x54   :  { %582 = vmatpush.bf16.msrb.mxu2 %v1013_v56 }
  0x55   :  { %595 = vmatpush.bf16.msrb.mxu3 %v1141_v60 }
  0x56   :  { %557 = vmatpush.bf16.msrb.mxu0 %v993_v2 }
  0x57   :  { %570 = vmatpush.bf16.msrb.mxu1 %v1121_v3 }
  0x58   :  { %583 = vmatpush.bf16.msrb.mxu2 %v997_v4 }
  0x59   :  { %596 = vmatpush.bf16.msrb.mxu3 %v1125_v5  ;;  %558 = vmatmul.bf16.vlgmr.msrb.gmra.mxu0 %v1707_v49 }
  0x5a   :  { %886 = vmatpush.bf16.msra.mxu0 %v1437_v6  ;;  %571 = vmatmul.bf16.vlgmr.msrb.gmra.mxu1 %v1709_v53 }
  0x5b   :  { %899 = vmatpush.bf16.msra.mxu1 %v1445_v7  ;;  %584 = vmatmul.bf16.vlgmr.msrb.gmra.mxu2 %v1707_v49  ;;  %v1431_v49 = vld [vmem:[#allocation9 + $0x8] sm:$0xff]  ;;  %v173_v7 = vperm.slane %v1719_v22, 3 }
  0x5c   :  { %597 = vmatmul.bf16.vlgmr.msrb.gmra.mxu3 %v1709_v53  ;;  %v1440_v53 = vld [vmem:[#allocation9 + $0x50] sm:$0xff]  ;;  %912 = vmatpush.bf16.msra.mxu2 %v1453_v18 }
  0x5d   :  { %925 = vmatpush.bf16.msra.mxu3 %v1461_v23 }
  0x5e   :  { %887 = vmatpush.bf16.msra.mxu0 %v1436_v8 }
  0x5f   :  { %900 = vmatpush.bf16.msra.mxu1 %v1444_v10 }
  0x60   :  { %913 = vmatpush.bf16.msra.mxu2 %v1452_v20 }
  0x61   :  { %926 = vmatpush.bf16.msra.mxu3 %v1460_v26 }
  0x62   :  { %888 = vmatpush.bf16.msra.mxu0 %v1435_v9 }
  0x63   :  { %901 = vmatpush.bf16.msra.mxu1 %v1443_v12 }
  0x64   :  { %914 = vmatpush.bf16.msra.mxu2 %v1451_v24 }
  0x65   :  { %927 = vmatpush.bf16.msra.mxu3 %v1459_v31 }
  0x66   :  { %889 = vmatpush.bf16.msra.mxu0 %v1434_v11 }
  0x67   :  { %902 = vmatpush.bf16.msra.mxu1 %v1442_v14 }
  0x68   :  { %915 = vmatpush.bf16.msra.mxu2 %v1450_v28 }
  0x69   :  { %928 = vmatpush.bf16.msra.mxu3 %v1458_v36 }
  0x6a   :  { %890 = vmatpush.bf16.msra.mxu0 %v1433_v13 }
  0x6b   :  { %903 = vmatpush.bf16.msra.mxu1 %v1441_v16 }
  0x6c   :  { %916 = vmatpush.bf16.msra.mxu2 %v1449_v34 }
  0x6d   :  { %929 = vmatpush.bf16.msra.mxu3 %v1457_v44 }
  0x6e   :  { %891 = vmatpush.bf16.msra.mxu0 %v1432_v15 }
  0x6f   :  { %904 = vmatpush.bf16.msra.mxu1 %v1440_v53 }
  0x70   :  { %917 = vmatpush.bf16.msra.mxu2 %v1448_v41  ;;  %v942_v41 = vstv %s1741_s6 }
  0x71   :  { %930 = vmatpush.bf16.msra.mxu3 %v1456_v50 }
  0x72   :  { %892 = vmatpush.bf16.msra.mxu0 %v1431_v49 }
  0x73   :  { %905 = vmatpush.bf16.msra.mxu1 %v1439_v19 }
  0x74   :  { %918 = vmatpush.bf16.msra.mxu2 %v1447_v46 }
  0x75   :  { %931 = vmatpush.bf16.msra.mxu3 %v1455_v57 }
  0x76   :  { %893 = vmatpush.bf16.msra.mxu0 %v1430_v17 }
  0x77   :  { %906 = vmatpush.bf16.msra.mxu1 %v1438_v21 }
  0x78   :  { %919 = vmatpush.bf16.msra.mxu2 %v1446_v55 }
  0x79   :  { %932 = vmatpush.bf16.msra.mxu3 %v1454_v61 }
  0xb6   :  { %v507_v27 = vpop.f32.mrf.mxu0 }
  0xb7   :  { %v508_v29 = vadd.f32 %v507_v27, %v170_v25  ;;  %v520_v30 = vpop.f32.mrf.mxu1 }
  0xb9   :  { %v521_v32 = vadd.f32 %v520_v30, %v508_v29  ;;  %v1474_v30 = vld [vmem:[%s1739_s4] ss:$0 sm:$0xff]  ;;  %s1648_s4 = smov 112  }
  0xbb   :  { %v602_v35 = vmul.f32 0.5, %v521_v32 }
  0xbd   :  { %1475 = vtanh.f32 %v602_v35 }
  0xbe   :  { %v533_v37 = vpop.f32.mrf.mxu2  ;;  %v509_v40 = vpop.f32.mrf.mxu0 }
  0xbf   :  { %v534_v38 = vadd.f32 %v533_v37, %v171_v33  ;;  %v546_v39 = vpop.f32.mrf.mxu3  ;;  %v522_v42 = vpop.f32.mrf.mxu1 }
  0xc1   :  { %v547_v43 = vadd.f32 %v546_v39, %v534_v38 }
  0xc3   :  { %v603_v45 = vmul.f32 0.5, %v547_v43  ;;  %v1476_v47 = vpop.eup %1475 }
  0xc4   :  { %v610_v48 = vmul.f32 0.5, %v1476_v47 }
  0xc5   :  { %1477 = vtanh.f32 %v603_v45 }
  0xc6   :  { %v535_v51 = vpop.f32.mrf.mxu2  ;;  %v614_v52 = vadd.f32 0.5, %v610_v48 }
  0xc7   :  { %v548_v54 = vpop.f32.mrf.mxu3 }
  0xc8   :  { %v618_v56 = vmul.f32 %v614_v52, %v521_v32 }
  0xca   :  { %v622_v59 = vpack.c.bf16 %v618_v56, %v618_v56 }
  0xcb   :  { %v1478_v58 = vpop.eup %1477 }
  0xcc   :  { %v611_v60 = vmul.f32 0.5, %v1478_v58  ;;  %894 = vmatmul.bf16.vlgmr.msra.gmra.mxu0 %v622_v59 }
  0xce   :  { %v615_v62 = vadd.f32 0.5, %v611_v60 }
  0xd0   :  { %v619_v63 = vmul.f32 %v615_v62, %v547_v43  ;;  %v947_v43 = vpop.permute.xlu0 %946 }
  0xd2   :  { %v623_v2 = vpack.c.bf16 %v619_v63, %v619_v63 }
  0xd4   :  { %907 = vmatmul.bf16.vlgmr.msra.gmra.mxu1 %v623_v2 }
  0xd6   :  { %v559_v3 = vpop.f32.mrf.mxu0 }
  0xd7   :  { %v560_v4 = vadd.f32 %v559_v3, %v172_v0  ;;  %v572_v5 = vpop.f32.mrf.mxu1 }
  0xd9   :  { %v573_v6 = vadd.f32 %v572_v5, %v560_v4 }
  0xdb   :  { %v604_v8 = vmul.f32 0.5, %v573_v6 }
  0xdd   :  { %1479 = vtanh.f32 %v604_v8 }
  0xde   :  { %v585_v9 = vpop.f32.mrf.mxu2  ;;  %v561_v12 = vpop.f32.mrf.mxu0 }
  0xdf   :  { %v586_v10 = vadd.f32 %v585_v9, %v173_v7  ;;  %v598_v11 = vpop.f32.mrf.mxu3  ;;  %v574_v13 = vpop.f32.mrf.mxu1 }
  0xe1   :  { %v599_v14 = vadd.f32 %v598_v11, %v586_v10 }
  0xe3   :  { %v605_v15 = vmul.f32 0.5, %v599_v14  ;;  %v1480_v16 = vpop.eup %1479 }
  0xe4   :  { %v612_v49 = vmul.f32 0.5, %v1480_v16 }
  0xe5   :  { %1481 = vtanh.f32 %v605_v15 }
  0xe6   :  { %v587_v53 = vpop.f32.mrf.mxu2  ;;  %v616_v17 = vadd.f32 0.5, %v612_v49 }
  0xe7   :  { %v600_v18 = vpop.f32.mrf.mxu3 }
  0xe8   :  { %v620_v19 = vmul.f32 %v616_v17, %v573_v6 }
  0xea   :  { %v624_v21 = vpack.c.bf16 %v620_v19, %v620_v19 }
  0xeb   :  { %v1482_v20 = vpop.eup %1481 }
  0xec   :  { %v613_v23 = vmul.f32 0.5, %v1482_v20  ;;  %920 = vmatmul.bf16.vlgmr.msra.gmra.mxu2 %v624_v21 }
  0xee   :  { %v617_v22 = vadd.f32 0.5, %v613_v23 }
  0xf0   :  { %v621_v24 = vmul.f32 %v617_v22, %v599_v14 }
  0xf2   :  { %v625_v25 = vpack.c.bf16 %v621_v24, %v621_v24 }
  0xf4   :  { %933 = vmatmul.bf16.vlgmr.msra.gmra.mxu3 %v625_v25 }
 0x149   :  { %v895_v26 = vpop.f32.mrf.mxu0 }
 0x14a   :  { %v896_v31 = vadd.f32 %v1474_v30, %v895_v26 }
 0x151   :  { %v908_v27 = vpop.f32.mrf.mxu1  ;;  %v897_v28 = vpop.f32.mrf.mxu0 }
 0x152   :  { %v909_v33 = vadd.f32 %v908_v27, %v896_v31 }
 0x159   :  { %v910_v29 = vpop.f32.mrf.mxu1 }
 0x16f   :  { %v921_v32 = vpop.f32.mrf.mxu2 }
 0x170   :  { %v922_v34 = vadd.f32 %v921_v32, %v909_v33 }
 0x177   :  { %v934_v35 = vpop.f32.mrf.mxu3  ;;  %v923_v37 = vpop.f32.mrf.mxu2 }
 0x178   :  { %v935_v36 = vadd.f32 %v934_v35, %v922_v34 }
 0x17a   :  { %v939_v38 = vmul.f32 0.5, %v935_v36  ;;  %956 = vst [vmem:[#allocation12] sm:$0xff] %v935_v36 }
 0x17c   :  { %v940_v39 = vmul.f32 1.442695, %v939_v38 }
 0x17e   :  { %1483 = vpow2.f32 %v940_v39 }
 0x17f   :  { %v936_v40 = vpop.f32.mrf.mxu3 }
 0x184   :  { %v1484_v42 = vpop.eup %1483 }
 0x185   :  { %v943_v44 = vmul.f32 %v1484_v42, %v942_v41 }
 0x187   :  { %v949_v45 = vmul.f32 %v947_v43, %v943_v44 }
 0x189   :  { %951 = vrot.lane.b32.xlu0 %v949_v45, %s1648_s4 }
 0x1fb   :  { %v952_v46 = vpop.permute.xlu0 %951 }
 0x1fc   :  { %v954_v47 = vadd.f32 %v952_v46, %v935_v36 }
 0x1fe   :  { %1485 = vtanh.f32 %v954_v47 }
 0x204   :  { %v1486_v48 = vpop.eup %1485 }
 0x205   :  { %958 = vrot.lane.b32.xlu1 %v1486_v48, %s1649_s29 }
 0x277   :  { %v959_v50 = vpop.permute.xlu1 %958 }
 0x278   :  { %962 = vst.msk [vmem:[#allocation12] sm:$0xff] %vm961_vm0, %v959_v50 }
 0x279   :  { %973 = dma.vmem_to_hbm [thread:$0]  %s969_s8, 128, %s971_s11, [#allocation5]  }
 0x27a   :  { %1637 = dma.done.wait [#allocation5], 128  }
 0x27b   :  { %1638 = vsyncadd [#allocation5], 4294967168 }
 0x27c   :  { %978 = vsyncpa [#allocation4], 1 }
 0x27d   :  { %979 = vsyncpa [#allocation7], 1 }
 0x27e   :  { %980 = vsyncpa [#allocation10], 1 }
 0x27f   :  { %981 = vsyncpa [#allocation5], 1 }

</bundles_post_ra>
